<compile_context>
chip_gen: v7x
topology: tpu7x:2x2x1
jax: 0.10.0
libtpu: 0.0.40
codegen_flags: <defaults>
</compile_context>

<pallas_src>
import numpy as np

import jax
import jax.numpy as jnp
from jax.experimental import pallas as pl
from jax.experimental.pallas import tpu as pltpu


# --------------------------------------------------------------------------
# helpers
# --------------------------------------------------------------------------
def _round_up(x, m):
    return ((x + m - 1) // m) * m


def _sublane_pack(dtype):
    """Min sublane granularity: 8 rows for 32-bit, 16 for 16-bit, 32 for 8-bit."""
    itemsize = jnp.dtype(dtype).itemsize
    return 8 * max(1, 4 // itemsize)


def _device_defaults():
    """Per-TPU-generation tiling/VMEM defaults (conservative when unknown)."""
    try:
        kind = jax.devices()[0].device_kind.lower()
    except Exception:  # pragma: no cover
        kind = ""
    if ("v4" in kind) or ("v5" in kind) or ("v6" in kind):
        # Single TensorCore, 128 MiB physical VMEM: biggest tile that fits.
        return dict(vmem_budget_bytes=24 << 20, vmem_limit_bytes=64 << 20,
                    min_steps=1)
    # v7x (2 TCs, 64 MiB VMEM per core) or unknown: keep >=2 grid steps so
    # both cores get work, and stay well under the smaller VMEM.
    return dict(vmem_budget_bytes=20 << 20, vmem_limit_bytes=48 << 20,
                min_steps=2)


# --------------------------------------------------------------------------
# Fast path: W already a multiple of 128 lanes -> pure strided HBM->HBM DMA,
# one per channel; nothing is staged through VMEM and there is no grid.
# --------------------------------------------------------------------------
def _dma_permute_kernel(x_hbm, o_hbm, sems):
    C, _, W = x_hbm.shape
    copies = [
        pltpu.make_async_copy(
            x_hbm.at[c],                    # (H, W) channel plane (contiguous)
            o_hbm.at[:, pl.ds(c * W, W)],   # 128-lane-aligned column band
            sems.at[c],
        )
        for c in range(C)                   # C is 3 or 4 -> static unroll
    ]
    for cp in copies:
        cp.start()
    for cp in copies:
        cp.wait()


def _permute_via_dma(x):
    C, H, W = x.shape
    itemsize = jnp.dtype(x.dtype).itemsize
    return pl.pallas_call(
        _dma_permute_kernel,
        out_shape=jax.ShapeDtypeStruct((H, C * W), x.dtype),
        in_specs=[pl.BlockSpec(memory_space=pl.ANY)],
        out_specs=pl.BlockSpec(memory_space=pl.ANY),
        scratch_shapes=[pltpu.SemaphoreType.DMA((C,))],
        cost_estimate=pl.CostEstimate(
            flops=0, transcendentals=0,
            bytes_accessed=2 * C * H * W * itemsize),
    )(x)


# --------------------------------------------------------------------------
# General path: VMEM-staged, H-tiled copy into a lane-padded output slab.
# --------------------------------------------------------------------------
def _chw_to_hcw_kernel(x_ref, o_ref):
    """x_ref: (C, tile_h, W); o_ref: (tile_h, C*Wp), Wp = round_up(W, 128).

    o[h, c*Wp + w] = x[c, h, w].  C is tiny and static, so the loop is fully
    unrolled into C dense (tile_h, W) copies whose destinations start at
    128-lane-aligned offsets (no XLU shifts; at most one aligned masked
    store at the trailing partial lane group).  Pad lanes are left untouched
    and sliced away on the host.
    """
    C, _, W = x_ref.shape
    Wp = o_ref.shape[1] // C
    for c in range(C):                      # static unroll (C is 3 or 4)
        o_ref[:, c * Wp:c * Wp + W] = x_ref[c]


def _pick_tile_h(H, C, W, dtype, vmem_budget_bytes, min_steps):
    itemsize = jnp.dtype(dtype).itemsize
    sub = _sublane_pack(dtype)
    Wp = _round_up(W, 128)

    def padded_footprint(th):
        thp = _round_up(th, sub)
        in_tile = C * thp * Wp * itemsize     # input block, lane-padded
        out_tile = thp * C * Wp * itemsize    # output block (already padded)
        return 2 * (in_tile + out_tile)       # x2: double-buffered pipeline

    cands = [d for d in range(sub, H + 1, sub)
             if H % d == 0 and padded_footprint(d) <= vmem_budget_bytes]
    multi = [d for d in cands if H // d >= min_steps]   # v7x: feed both TCs
    if multi:
        return max(multi)
    if cands:
        return max(cands)
    small = [d for d in range(sub, H + 1, sub) if H % d == 0]
    return min(small) if small else H        # full-H block is always legal


def _permute_via_vmem(x, tile_h, vmem_budget_bytes, vmem_limit_bytes,
                      min_steps):
    C, H, W = x.shape
    itemsize = jnp.dtype(x.dtype).itemsize
    sub = _sublane_pack(x.dtype)
    Wp = _round_up(W, 128)

    if tile_h is not None:
        # Must divide H and respect packed-dtype sublane granularity
        # (or be the full dimension); otherwise fall back to auto choice.
        if H % tile_h != 0 or (tile_h % sub != 0 and tile_h != H):
            tile_h = None
    if tile_h is None:
        tile_h = _pick_tile_h(H, C, W, x.dtype, vmem_budget_bytes, min_steps)

    return pl.pallas_call(
        _chw_to_hcw_kernel,
        out_shape=jax.ShapeDtypeStruct((H, C * Wp), x.dtype),
        grid=(H // tile_h,),
        in_specs=[pl.BlockSpec((C, tile_h, W), lambda i: (0, i, 0))],
        out_specs=pl.BlockSpec((tile_h, C * Wp), lambda i: (i, 0)),
        compiler_params=pltpu.CompilerParams(
            # Row tiles are independent -> shard across TCs on v7x megacore.
            dimension_semantics=("parallel",),
            vmem_limit_bytes=vmem_limit_bytes),
        cost_estimate=pl.CostEstimate(
            flops=0, transcendentals=0,
            bytes_accessed=(C * H * W + H * C * Wp) * itemsize),
    )(x)


# --------------------------------------------------------------------------
# Public wrappers
# --------------------------------------------------------------------------
def permute_chw_planes(x: jax.Array, *, tile_h=None, vmem_budget_bytes=None,
                       vmem_limit_bytes=None) -> jax.Array:
    """(C, H, W) -> (H, C*Wp) lane-dense slab, Wp = round_up(W, 128).

    Row h holds the C channel planes of row h laid out contiguously, each
    plane starting at a 128-lane-aligned offset, i.e. the device array is a
    row-major (H, C, Wp) tensor.  When W is already a multiple of 128 the
    permute is done with strided HBM->HBM DMAs (no VMEM staging at all).
    """
    C, H, W = x.shape
    defaults = _device_defaults()
    if vmem_budget_bytes is None:
        vmem_budget_bytes = defaults["vmem_budget_bytes"]
    if vmem_limit_bytes is None:
        vmem_limit_bytes = defaults["vmem_limit_bytes"]

    if W % 128 == 0 and tile_h is None:
        return _permute_via_dma(x)
    return _permute_via_vmem(x, tile_h, vmem_budget_bytes, vmem_limit_bytes,
                             defaults["min_steps"])


def tensor_to_numpy(sample: jax.Array, *, tile_h=None, use_kernel=True,
                    contiguous=False) -> dict:
    """Full forward-pass equivalent of TensorToNumpy.forward.

    Returns {'image': (H, W, C) numpy array}.  Like torch's
    permute(1, 2, 0).numpy(), the result is a non-contiguous stride view;
    pass contiguous=True to force an ascontiguousarray copy.
    """
    C, H, W = sample.shape
    if not use_kernel:
        # Host-only path (review item): device_get + transpose view has
        # identical semantics and skips the on-device HBM round trip.
        img = np.asarray(jax.device_get(sample)).transpose(1, 2, 0)
    else:
        planes = permute_chw_planes(sample, tile_h=tile_h)      # (H, C*Wp)
        Wp = planes.shape[1] // C
        host = np.asarray(jax.device_get(planes)).reshape(H, C, Wp)
        img = host[:, :, :W].transpose(0, 2, 1)                 # (H, W, C) view
    if contiguous:
        img = np.ascontiguousarray(img)
    return {"image": img}


# --------------------------------------------------------------------------
# Self-test
# --------------------------------------------------------------------------
if __name__ == "__main__":
    key = jax.random.PRNGKey(0)
    k1, k2, k3 = jax.random.split(key, 3)

    # 1) 128-lane-aligned width -> zero-VMEM strided HBM->HBM DMA path.
    C, H, W = 3, 16, 128
    x1 = jax.random.normal(k1, (C, H, W), dtype=jnp.float32)
    planes1 = permute_chw_planes(x1)
    jax.block_until_ready(planes1)
    assert planes1.shape == (H, C * W), planes1.shape
    ref1 = np.transpose(np.asarray(jax.device_get(x1)), (1, 2, 0))
    img1 = tensor_to_numpy(x1)["image"]
    assert img1.shape == (H, W, C) and img1.dtype == np.float32
    np.testing.assert_array_equal(img1, ref1)

    # 2) Unaligned width (W=32) -> padded, VMEM-staged tiled-copy path.
    C, H, W = 3, 32, 32
    x2 = jax.random.normal(k2, (C, H, W), dtype=jnp.float32)
    planes2 = permute_chw_planes(x2, tile_h=8)       # forced multi-step grid
    jax.block_until_ready(planes2)
    ref2 = np.transpose(np.asarray(jax.device_get(x2)), (1, 2, 0))
    np.testing.assert_array_equal(tensor_to_numpy(x2, tile_h=8)["image"], ref2)
    np.testing.assert_array_equal(tensor_to_numpy(x2)["image"], ref2)  # auto tile
    np.testing.assert_array_equal(tensor_to_numpy(x2, use_kernel=False)["image"],
                                  ref2)                               # host path

    # 3) bf16 input -> dtype-aware (16-row) sublane granularity in the picker.
    C, H, W = 3, 64, 32
    x3 = jax.random.normal(k3, (C, H, W), dtype=jnp.float32).astype(jnp.bfloat16)
    ref3 = np.transpose(np.asarray(jax.device_get(x3)), (1, 2, 0))
    np.testing.assert_array_equal(tensor_to_numpy(x3)["image"], ref3)

    print("KERNEL_OK")
</pallas_src>

<mosaic_0001>
module attributes {stable_mosaic.version = 11 : i64} {
  func.func @_dma_permute_kernel(%arg0: memref<3x16x128xf32, #tpu.memory_space<any>>, %arg1: memref<16x384xf32, #tpu.memory_space<any>>, %arg2: memref<3x!tpu.dma_semaphore, #tpu.memory_space<semaphore_mem>>) attributes {dimension_semantics = [], scalar_prefetch = 0 : i64, scratch_operands = 1 : i64, tpu.core_type = #tpu.core_type<tc>} {
    %c0_i32 = arith.constant 0 : i32
    %c0_i32_0 = arith.constant 0 : i32
    %c0_i32_1 = arith.constant 0 : i32
    %c0_i32_2 = arith.constant 0 : i32
    %0 = tpu.memref_slice %arg0[%c0_i32, %c0_i32_1, %c0_i32_2] : memref<3x16x128xf32, #tpu.memory_space<any>> -> memref<1x16x128xf32, #tpu.memory_space<any>>
    %1 = tpu.memref_squeeze %0 : memref<1x16x128xf32, #tpu.memory_space<any>> -> memref<16x128xf32, #tpu.memory_space<any>>
    %c0_i32_3 = arith.constant 0 : i32
    %c0_i32_4 = arith.constant 0 : i32
    %2 = tpu.memref_slice %arg1[%c0_i32_3, %c0_i32_4] : memref<16x384xf32, #tpu.memory_space<any>> -> memref<16x128xf32, #tpu.memory_space<any>>
    %3 = tpu.memref_slice %arg2[%c0_i32_0] : memref<3x!tpu.dma_semaphore, #tpu.memory_space<semaphore_mem>> -> memref<1x!tpu.dma_semaphore, #tpu.memory_space<semaphore_mem>>
    %4 = tpu.memref_squeeze %3 : memref<1x!tpu.dma_semaphore, #tpu.memory_space<semaphore_mem>> -> memref<!tpu.dma_semaphore, #tpu.memory_space<semaphore_mem>>
    tpu.enqueue_dma source(%1 : memref<16x128xf32, #tpu.memory_space<any>>) target(%2 : memref<16x128xf32, #tpu.memory_space<any>>) target_semaphore(%4 : memref<!tpu.dma_semaphore, #tpu.memory_space<semaphore_mem>>)
    %c1_i32 = arith.constant 1 : i32
    %c1_i32_5 = arith.constant 1 : i32
    %c0_i32_6 = arith.constant 0 : i32
    %c0_i32_7 = arith.constant 0 : i32
    %5 = tpu.memref_slice %arg0[%c1_i32, %c0_i32_6, %c0_i32_7] : memref<3x16x128xf32, #tpu.memory_space<any>> -> memref<1x16x128xf32, #tpu.memory_space<any>>
    %6 = tpu.memref_squeeze %5 : memref<1x16x128xf32, #tpu.memory_space<any>> -> memref<16x128xf32, #tpu.memory_space<any>>
    %c0_i32_8 = arith.constant 0 : i32
    %c128_i32 = arith.constant 128 : i32
    %7 = tpu.memref_slice %arg1[%c0_i32_8, %c128_i32] : memref<16x384xf32, #tpu.memory_space<any>> -> memref<16x128xf32, #tpu.memory_space<any>>
    %8 = tpu.memref_slice %arg2[%c1_i32_5] : memref<3x!tpu.dma_semaphore, #tpu.memory_space<semaphore_mem>> -> memref<1x!tpu.dma_semaphore, #tpu.memory_space<semaphore_mem>>
    %9 = tpu.memref_squeeze %8 : memref<1x!tpu.dma_semaphore, #tpu.memory_space<semaphore_mem>> -> memref<!tpu.dma_semaphore, #tpu.memory_space<semaphore_mem>>
    tpu.enqueue_dma source(%6 : memref<16x128xf32, #tpu.memory_space<any>>) target(%7 : memref<16x128xf32, #tpu.memory_space<any>>) target_semaphore(%9 : memref<!tpu.dma_semaphore, #tpu.memory_space<semaphore_mem>>)
    %c2_i32 = arith.constant 2 : i32
    %c2_i32_9 = arith.constant 2 : i32
    %c0_i32_10 = arith.constant 0 : i32
    %c0_i32_11 = arith.constant 0 : i32
    %10 = tpu.memref_slice %arg0[%c2_i32, %c0_i32_10, %c0_i32_11] : memref<3x16x128xf32, #tpu.memory_space<any>> -> memref<1x16x128xf32, #tpu.memory_space<any>>
    %11 = tpu.memref_squeeze %10 : memref<1x16x128xf32, #tpu.memory_space<any>> -> memref<16x128xf32, #tpu.memory_space<any>>
    %c0_i32_12 = arith.constant 0 : i32
    %c256_i32 = arith.constant 256 : i32
    %12 = tpu.memref_slice %arg1[%c0_i32_12, %c256_i32] : memref<16x384xf32, #tpu.memory_space<any>> -> memref<16x128xf32, #tpu.memory_space<any>>
    %13 = tpu.memref_slice %arg2[%c2_i32_9] : memref<3x!tpu.dma_semaphore, #tpu.memory_space<semaphore_mem>> -> memref<1x!tpu.dma_semaphore, #tpu.memory_space<semaphore_mem>>
    %14 = tpu.memref_squeeze %13 : memref<1x!tpu.dma_semaphore, #tpu.memory_space<semaphore_mem>> -> memref<!tpu.dma_semaphore, #tpu.memory_space<semaphore_mem>>
    tpu.enqueue_dma source(%11 : memref<16x128xf32, #tpu.memory_space<any>>) target(%12 : memref<16x128xf32, #tpu.memory_space<any>>) target_semaphore(%14 : memref<!tpu.dma_semaphore, #tpu.memory_space<semaphore_mem>>)
    %c0_i32_13 = arith.constant 0 : i32
    %c0_i32_14 = arith.constant 0 : i32
    %c0_i32_15 = arith.constant 0 : i32
    %c0_i32_16 = arith.constant 0 : i32
    %15 = tpu.memref_slice %arg0[%c0_i32_13, %c0_i32_15, %c0_i32_16] : memref<3x16x128xf32, #tpu.memory_space<any>> -> memref<1x16x128xf32, #tpu.memory_space<any>>
    %16 = tpu.memref_squeeze %15 : memref<1x16x128xf32, #tpu.memory_space<any>> -> memref<16x128xf32, #tpu.memory_space<any>>
    %c0_i32_17 = arith.constant 0 : i32
    %c0_i32_18 = arith.constant 0 : i32
    %17 = tpu.memref_slice %arg1[%c0_i32_17, %c0_i32_18] : memref<16x384xf32, #tpu.memory_space<any>> -> memref<16x128xf32, #tpu.memory_space<any>>
    %18 = tpu.memref_slice %arg2[%c0_i32_14] : memref<3x!tpu.dma_semaphore, #tpu.memory_space<semaphore_mem>> -> memref<1x!tpu.dma_semaphore, #tpu.memory_space<semaphore_mem>>
    %19 = tpu.memref_squeeze %18 : memref<1x!tpu.dma_semaphore, #tpu.memory_space<semaphore_mem>> -> memref<!tpu.dma_semaphore, #tpu.memory_space<semaphore_mem>>
    tpu.wait_dma2 semaphore(%19 : memref<!tpu.dma_semaphore, #tpu.memory_space<semaphore_mem>>) src(%16 : memref<16x128xf32, #tpu.memory_space<any>>) dst(%17 : memref<16x128xf32, #tpu.memory_space<any>>)
    %c1_i32_19 = arith.constant 1 : i32
    %c1_i32_20 = arith.constant 1 : i32
    %c0_i32_21 = arith.constant 0 : i32
    %c0_i32_22 = arith.constant 0 : i32
    %20 = tpu.memref_slice %arg0[%c1_i32_19, %c0_i32_21, %c0_i32_22] : memref<3x16x128xf32, #tpu.memory_space<any>> -> memref<1x16x128xf32, #tpu.memory_space<any>>
    %21 = tpu.memref_squeeze %20 : memref<1x16x128xf32, #tpu.memory_space<any>> -> memref<16x128xf32, #tpu.memory_space<any>>
    %c0_i32_23 = arith.constant 0 : i32
    %c128_i32_24 = arith.constant 128 : i32
    %22 = tpu.memref_slice %arg1[%c0_i32_23, %c128_i32_24] : memref<16x384xf32, #tpu.memory_space<any>> -> memref<16x128xf32, #tpu.memory_space<any>>
    %23 = tpu.memref_slice %arg2[%c1_i32_20] : memref<3x!tpu.dma_semaphore, #tpu.memory_space<semaphore_mem>> -> memref<1x!tpu.dma_semaphore, #tpu.memory_space<semaphore_mem>>
    %24 = tpu.memref_squeeze %23 : memref<1x!tpu.dma_semaphore, #tpu.memory_space<semaphore_mem>> -> memref<!tpu.dma_semaphore, #tpu.memory_space<semaphore_mem>>
    tpu.wait_dma2 semaphore(%24 : memref<!tpu.dma_semaphore, #tpu.memory_space<semaphore_mem>>) src(%21 : memref<16x128xf32, #tpu.memory_space<any>>) dst(%22 : memref<16x128xf32, #tpu.memory_space<any>>)
    %c2_i32_25 = arith.constant 2 : i32
    %c2_i32_26 = arith.constant 2 : i32
    %c0_i32_27 = arith.constant 0 : i32
    %c0_i32_28 = arith.constant 0 : i32
    %25 = tpu.memref_slice %arg0[%c2_i32_25, %c0_i32_27, %c0_i32_28] : memref<3x16x128xf32, #tpu.memory_space<any>> -> memref<1x16x128xf32, #tpu.memory_space<any>>
    %26 = tpu.memref_squeeze %25 : memref<1x16x128xf32, #tpu.memory_space<any>> -> memref<16x128xf32, #tpu.memory_space<any>>
    %c0_i32_29 = arith.constant 0 : i32
    %c256_i32_30 = arith.constant 256 : i32
    %27 = tpu.memref_slice %arg1[%c0_i32_29, %c256_i32_30] : memref<16x384xf32, #tpu.memory_space<any>> -> memref<16x128xf32, #tpu.memory_space<any>>
    %28 = tpu.memref_slice %arg2[%c2_i32_26] : memref<3x!tpu.dma_semaphore, #tpu.memory_space<semaphore_mem>> -> memref<1x!tpu.dma_semaphore, #tpu.memory_space<semaphore_mem>>
    %29 = tpu.memref_squeeze %28 : memref<1x!tpu.dma_semaphore, #tpu.memory_space<semaphore_mem>> -> memref<!tpu.dma_semaphore, #tpu.memory_space<semaphore_mem>>
    tpu.wait_dma2 semaphore(%29 : memref<!tpu.dma_semaphore, #tpu.memory_space<semaphore_mem>>) src(%26 : memref<16x128xf32, #tpu.memory_space<any>>) dst(%27 : memref<16x128xf32, #tpu.memory_space<any>>)
    return
  }
}

</mosaic_0001>

<bundles_post_ra>
// kernel: tpu_custom_call.1
= control target key start
LH: loop header
LB: loop body
LE: loop exit
PB: predicated region body
PF: predicated region fallthrough
CT: control target
= control target key end

     0   :  { %s116_s6 = smov 128   ;;  %s117_s7 = smov 384   ;;  %s154_s0 = inlined_call_operand.hbm [shape: f32[3,16,128], index: 0, kind: input, shape index: {}]   ;;  %s155_s1 = inlined_call_operand.hbm [shape: f32[16,384], index: 1, kind: output, shape index: {}]  }
   0x1   :  { %18 = sst [smem:[#allocation4]] %s116_s6  ;;  %s118_s8 = smov 8  }
   0x2   :  { %20 = sst [smem:[#allocation4 + $0x1]] %s117_s7  ;;  %s25_s11 = scalar_lea.hbm %s154_s0, 256 }
   0x3   :  { %22 = sst [smem:[#allocation4 + $0x2]] %s118_s8  ;;  %s119_s12 = smov [#allocation2]  }
   0x4   :  { %s120_s13 = smov [#allocation3]   ;;  %s121_s14 = smov 0  }
   0x5   :  { %24 = dma.general %s154_s0, 256, %s155_s1, %s119_s12, %s120_s13, [#allocation4], %s121_s14, 0  }
   0x6   :  { %40 = sst [smem:[#allocation6]] %s116_s6  ;;  %s26_s21 = scalar_lea.hbm %s155_s1, 128 }
   0x7   :  { %42 = sst [smem:[#allocation6 + $0x1]] %s117_s7  ;;  %s122_s22 = smov [#allocation2 + $0x1]  }
   0x8   :  { %44 = sst [smem:[#allocation6 + $0x2]] %s118_s8  ;;  %s123_s23 = smov [#allocation5]  }
   0x9   :  { %46 = dma.general %s25_s11, 256, %s26_s21, %s122_s22, %s123_s23, [#allocation6], %s121_s14, 0  }
   0xa   :  { %62 = sst [smem:[#allocation8]] %s116_s6  ;;  %s47_s26 = scalar_lea.hbm %s154_s0, 512 }
   0xb   :  { %64 = sst [smem:[#allocation8 + $0x1]] %s117_s7  ;;  %s48_s29 = scalar_lea.hbm %s155_s1, 256 }
   0xc   :  { %66 = sst [smem:[#allocation8 + $0x2]] %s118_s8  ;;  %s124_s30 = smov [#allocation2 + $0x2]  }
   0xd   :  { %s125_s2 = smov [#allocation7]  }
   0xe   :  { %68 = dma.general %s47_s26, 256, %s48_s29, %s124_s30, %s125_s2, [#allocation8], %s121_s14, 0  }
   0xf   :  { %110 = dma.done.wait [#allocation2], 256 }
  0x10   :  { %111 = vsyncadd [#allocation2], 4294967040 }
  0x11   :  { %112 = dma.done.wait [#allocation2 + $0x1], 256 }
  0x12   :  { %113 = vsyncadd [#allocation2 + $0x1], 4294967040 }
  0x13   :  { %114 = dma.done.wait [#allocation2 + $0x2], 256 }
  0x14   :  { %115 = vsyncadd [#allocation2 + $0x2], 4294967040 }
  0x15   :  { %77 = vsyncmov [#allocation2] }
  0x18   :  { %s78_s3 = vpop.sfrf %77 }
  0x19   :  { %p97_p0 = scmp.ne.s32.totalorder %s78_s3, 0 }
  0x1b   :  { %82 = shalt.err (%p97_p0)  }
  0x1c   :  { %84 = vsyncmov [#allocation2 + $0x1] }
  0x1f   :  { %s85_s0 = vpop.sfrf %84 }
  0x20   :  { %p98_p1 = scmp.ne.s32.totalorder %s85_s0, 0 }
  0x22   :  { %89 = shalt.err (%p98_p1)  }
  0x23   :  { %91 = vsyncmov [#allocation2 + $0x2] }
  0x26   :  { %s92_s1 = vpop.sfrf %91 }
  0x27   :  { %p99_p2 = scmp.ne.s32.totalorder %s92_s1, 0 }
  0x29   :  { %96 = shalt.err (%p99_p2)  }

</bundles_post_ra>
